<compile_context>
chip_gen: v7x
topology: tpu7x:2x2x1
jax: 0.10.0
libtpu: 0.0.40
codegen_flags: <defaults>
</compile_context>

<pallas_src>
import functools

import jax
import jax.numpy as jnp
from jax.experimental import pallas as pl
from jax.experimental.pallas import tpu as pltpu


# ---------------------------------------------------------------------------
# Pallas kernel: conv3x3(valid, 1->1 ch) as banded MXU matmuls + ELU + MLP
# ---------------------------------------------------------------------------
def neuralnet_kernel(
    x1_ref, x2_ref, x3_ref,          # VMEM (bm, W)        f32 inputs
    m1_ref, m2_ref, m3_ref,          # VMEM (W, Wout)      banded conv mats (compute_dtype)
    cb_ref,                          # VMEM (1, Wout)      conv bias row (f32)
    w1_ref, b1_ref,                  # VMEM (Wout, H1) cdt, (1, H1) f32   (y = x @ W + b)
    w2_ref, b2_ref,
    w3_ref, b3_ref,
    w4_ref, b4_ref,
    w5_ref, b5_ref,                  # VMEM (H4, C) cdt,   (1, C) f32
    out_ref,                         # VMEM (bm, C)        f32
    *, act_dtype,
):
    f32 = jnp.float32
    cdt = m1_ref.dtype

    # Conv2d(1,1,kernel=3,stride=1,pad=0) over the stacked (x1,x2,x3) rows,
    # ridden on the MXU as three banded matmuls:
    #   out[b, o] = conv_b + sum_i sum_j conv_w[i, j] * x_i[b, o + j]
    # Operands in compute_dtype (MXU-native bf16 path); f32 accumulation.
    acc = jnp.dot(x1_ref[...].astype(cdt), m1_ref[...], preferred_element_type=f32)
    acc = acc + jnp.dot(x2_ref[...].astype(cdt), m2_ref[...], preferred_element_type=f32)
    acc = acc + jnp.dot(x3_ref[...].astype(cdt), m3_ref[...], preferred_element_type=f32)
    acc = acc + cb_ref[...]
    # TODO(synk): if profiling shows the MXU as the binding slot, replace the
    # 97.7%-sparse band matmuls with 9 VPU FMAs on pltpu.roll'ed copies of x.

    def elu(v):
        # nn.ELU(alpha=1.0): v if v > 0 else exp(v) - 1.  Clamp the exponent so
        # undefined rows of a padded partial batch block cannot generate
        # Inf/NaN in the discarded branch (stores are masked anyway).
        return jnp.where(v > 0, v, jnp.exp(jnp.minimum(v, 0.0)) - 1.0)

    def layer(h, w_ref, b_ref):
        y = jnp.dot(h.astype(w_ref.dtype), w_ref[...], preferred_element_type=f32)
        return elu((y + b_ref[...]).astype(act_dtype))

    # NOTE: self.drop_out is defined in __init__ but never applied in forward().
    h = elu(acc.astype(act_dtype))
    h = layer(h, w1_ref, b1_ref)
    h = layer(h, w2_ref, b2_ref)
    h = layer(h, w3_ref, b3_ref)
    h = layer(h, w4_ref, b4_ref)
    out = jnp.dot(h.astype(w5_ref.dtype), w5_ref[...], preferred_element_type=f32)
    out_ref[...] = (out + b5_ref[...]).astype(out_ref.dtype)


# ---------------------------------------------------------------------------
# Wrapper
# ---------------------------------------------------------------------------
def _conv_band_matrices(conv_w, width, out_width):
    """M_i[w, o] = conv_w[i, w - o] for 0 <= w - o < 3 else 0, so x_i @ M_i
    realizes the width-3 valid cross-correlation on the MXU."""
    bands = [jnp.eye(width, out_width, k=-j, dtype=jnp.float32) for j in range(3)]

    def one(row):
        return row[0] * bands[0] + row[1] * bands[1] + row[2] * bands[2]

    return one(conv_w[0]), one(conv_w[1]), one(conv_w[2])


def _round_up(x, m):
    return ((x + m - 1) // m) * m


@functools.partial(jax.jit, static_argnames=("compute_dtype", "act_dtype"))
def neuralnet_forward(x_1, x_2, x_3, params,
                      compute_dtype=jnp.float32, act_dtype=None):
    # Recommended production settings:
    #   v6e / v7x : compute_dtype=bf16, act_dtype=bf16  (bf16 MXU + bf16 VPU/EUP)
    #   v5e       : compute_dtype=bf16, act_dtype=f32   (no bf16 VPU/EUP on v5e)
    # Defaults keep bit-close parity with the f32 PyTorch module.
    if act_dtype is None:
        act_dtype = jnp.float32

    B, Wfull = x_1.shape
    Wout = Wfull - 2                       # == fc1 input size
    H1 = params["w1"].shape[1]
    H2 = params["w2"].shape[1]
    H3 = params["w3"].shape[1]
    H4, C = params["w5"].shape

    m1, m2, m3 = _conv_band_matrices(params["conv_w"], Wfull, Wout)
    cb_scalar = jnp.asarray(params["conv_b"], jnp.float32).reshape(-1)[0]
    cb = jnp.full((1, Wout), cb_scalar, jnp.float32)

    cdt = compute_dtype
    f32 = jnp.float32
    weights = (
        m1.astype(cdt), m2.astype(cdt), m3.astype(cdt), cb,
        params["w1"].astype(cdt), params["b1"].reshape(1, -1).astype(f32),
        params["w2"].astype(cdt), params["b2"].reshape(1, -1).astype(f32),
        params["w3"].astype(cdt), params["b3"].reshape(1, -1).astype(f32),
        params["w4"].astype(cdt), params["b4"].reshape(1, -1).astype(f32),
        params["w5"].astype(cdt), params["b5"].reshape(1, -1).astype(f32),
    )

    # Batch grid: bm rows per step.  Weights use constant index_maps so they
    # are DMA'd once and stay resident; x / out DMAs are software-pipelined.
    # Once B > 128 we force >=4 grid steps so the "parallel" batch axis can be
    # sharded across both TensorCores on v7x (harmless on v5e/v6e).
    if B <= 128:
        bm = B
    else:
        bm = min(512, max(8, _round_up(pl.cdiv(B, 4), 8)))
    grid = (pl.cdiv(B, bm),)

    x_spec = pl.BlockSpec((bm, Wfull), lambda i: (i, 0))
    resident = lambda a: pl.BlockSpec(a.shape, lambda i: (0, 0))

    flops = 2 * B * (3 * Wfull * Wout + Wout * H1 + H1 * H2 + H2 * H3
                     + H3 * H4 + H4 * C)
    transcendentals = B * (Wout + H1 + H2 + H3 + H4)       # one exp per ELU elem
    weight_bytes = sum(int(w.size) * w.dtype.itemsize for w in weights)
    bytes_accessed = 4 * (3 * B * Wfull + B * C) + weight_bytes
    cost = pl.CostEstimate(flops=flops, transcendentals=transcendentals,
                           bytes_accessed=bytes_accessed)

    out = pl.pallas_call(
        functools.partial(neuralnet_kernel, act_dtype=act_dtype),
        out_shape=jax.ShapeDtypeStruct((B, C), jnp.float32),
        grid=grid,
        in_specs=[x_spec, x_spec, x_spec] + [resident(w) for w in weights],
        out_specs=pl.BlockSpec((bm, C), lambda i: (i, 0)),
        compiler_params=pltpu.CompilerParams(
            dimension_semantics=("parallel",)),
        cost_estimate=cost,
    )(x_1, x_2, x_3, *weights)

    return out


# ---------------------------------------------------------------------------
# Deterministic parameter construction (synthetic; matches module shapes,
# scaled down: input_size=128, hiddens=(64, 64, 32, 32), num_classes=2).
# ---------------------------------------------------------------------------
def make_params(key, input_size, h1, h2, h3, h4, num_classes):
    ks = jax.random.split(key, 12)

    def lin(kw, kb, fan_in, fan_out):
        bound = 1.0 / jnp.sqrt(float(fan_in))
        # Stored transposed relative to PyTorch: (in, out), so kernel does x @ W.
        w = jax.random.uniform(kw, (fan_in, fan_out), jnp.float32, -bound, bound)
        b = jax.random.uniform(kb, (1, fan_out), jnp.float32, -bound, bound)
        return w, b

    w1, b1 = lin(ks[0], ks[1], input_size, h1)
    w2, b2 = lin(ks[2], ks[3], h1, h2)
    w3, b3 = lin(ks[4], ks[5], h2, h3)
    w4, b4 = lin(ks[6], ks[7], h3, h4)
    w5, b5 = lin(ks[8], ks[9], h4, num_classes)

    cbound = 1.0 / 3.0  # 1/sqrt(in_ch * 3*3)
    conv_w = jax.random.uniform(ks[10], (3, 3), jnp.float32, -cbound, cbound)
    conv_b = jax.random.uniform(ks[11], (1, 1), jnp.float32, -cbound, cbound)

    return dict(conv_w=conv_w, conv_b=conv_b,
                w1=w1, b1=b1, w2=w2, b2=b2, w3=w3, b3=b3,
                w4=w4, b4=b4, w5=w5, b5=b5)


def reference_forward(x_1, x_2, x_3, params):
    x = jnp.stack((x_1, x_2, x_3), axis=1)  # (B, 3, W)
    W = x.shape[-1]
    cb = jnp.asarray(params["conv_b"], jnp.float32).reshape(-1)[0]
    out = jnp.full((x.shape[0], W - 2), cb, jnp.float32)
    for i in range(3):
        for j in range(3):
            out = out + params["conv_w"][i, j] * x[:, i, j:j + W - 2]
    h = jax.nn.elu(out)
    hi = jax.lax.Precision.HIGHEST
    for k in range(1, 5):
        h = jax.nn.elu(jnp.dot(h, params[f"w{k}"], precision=hi) + params[f"b{k}"])
    return jnp.dot(h, params["w5"], precision=hi) + params["b5"]


if __name__ == "__main__":
    # Small, shape-consistent sizes: conv output width must equal fc1 input
    # size, so the raw inputs have width input_size + 2.
    INPUT_SIZE, H1, H2, H3, H4, NUM_CLASSES = 128, 64, 64, 32, 32, 2

    key = jax.random.PRNGKey(0)
    k_in, k_par, k_in2 = jax.random.split(key, 3)
    params = make_params(k_par, INPUT_SIZE, H1, H2, H3, H4, NUM_CLASSES)

    # --- small batch, f32 (bit-close parity with the PyTorch forward) -------
    B = 2
    kx1, kx2, kx3 = jax.random.split(k_in, 3)
    x_1 = jax.random.normal(kx1, (B, INPUT_SIZE + 2), jnp.float32)
    x_2 = jax.random.normal(kx2, (B, INPUT_SIZE + 2), jnp.float32)
    x_3 = jax.random.normal(kx3, (B, INPUT_SIZE + 2), jnp.float32)

    out = jax.block_until_ready(neuralnet_forward(x_1, x_2, x_3, params))
    ref = reference_forward(x_1, x_2, x_3, params)
    assert out.shape == (B, NUM_CLASSES)
    assert jnp.allclose(out, ref, atol=1e-2, rtol=1e-2), (out, ref)

    # --- bf16 compute/activation path (recommended on v6e / v7x) ------------
    out_bf16 = jax.block_until_ready(
        neuralnet_forward(x_1, x_2, x_3, params,
                          compute_dtype=jnp.bfloat16, act_dtype=jnp.bfloat16))
    assert bool(jnp.isfinite(out_bf16).all())
    assert jnp.allclose(out_bf16, ref, atol=2e-1, rtol=2e-1), (out_bf16, ref)

    # --- B > 128: multi-step batch grid with a partial (masked) last block --
    B2 = 130
    ky1, ky2, ky3 = jax.random.split(k_in2, 3)
    y_1 = jax.random.normal(ky1, (B2, INPUT_SIZE + 2), jnp.float32)
    y_2 = jax.random.normal(ky2, (B2, INPUT_SIZE + 2), jnp.float32)
    y_3 = jax.random.normal(ky3, (B2, INPUT_SIZE + 2), jnp.float32)

    out2 = jax.block_until_ready(neuralnet_forward(y_1, y_2, y_3, params))
    ref2 = reference_forward(y_1, y_2, y_3, params)
    assert out2.shape == (B2, NUM_CLASSES)
    assert jnp.allclose(out2, ref2, atol=1e-2, rtol=1e-2)

    print("KERNEL_OK")
</pallas_src>

<mosaic_0001>
module attributes {stable_mosaic.version = 11 : i64} {
  func.func @neuralnet_kernel(%arg0: i32, %arg1: memref<2x130xf32, #tpu.memory_space<vmem>>, %arg2: memref<2x130xf32, #tpu.memory_space<vmem>>, %arg3: memref<2x130xf32, #tpu.memory_space<vmem>>, %arg4: memref<130x128xf32, #tpu.memory_space<vmem>>, %arg5: memref<130x128xf32, #tpu.memory_space<vmem>>, %arg6: memref<130x128xf32, #tpu.memory_space<vmem>>, %arg7: memref<1x128xf32, #tpu.memory_space<vmem>>, %arg8: memref<128x64xf32, #tpu.memory_space<vmem>>, %arg9: memref<1x64xf32, #tpu.memory_space<vmem>>, %arg10: memref<64x64xf32, #tpu.memory_space<vmem>>, %arg11: memref<1x64xf32, #tpu.memory_space<vmem>>, %arg12: memref<64x32xf32, #tpu.memory_space<vmem>>, %arg13: memref<1x32xf32, #tpu.memory_space<vmem>>, %arg14: memref<32x32xf32, #tpu.memory_space<vmem>>, %arg15: memref<1x32xf32, #tpu.memory_space<vmem>>, %arg16: memref<32x2xf32, #tpu.memory_space<vmem>>, %arg17: memref<1x2xf32, #tpu.memory_space<vmem>>, %arg18: memref<2x2xf32, #tpu.memory_space<vmem>>) attributes {dimension_semantics = [#tpu.dimension_semantics<parallel>], iteration_bounds = array<i64: 1>, scalar_prefetch = 0 : i64, scratch_operands = 0 : i64, tpu.core_type = #tpu.core_type<tc>, window_params = [{transform_indices = @transform_0, window_bounds = array<i64: 2, 130>}, {transform_indices = @transform_1, window_bounds = array<i64: 2, 130>}, {transform_indices = @transform_2, window_bounds = array<i64: 2, 130>}, {pipeline_mode = #tpu.pipeline_mode<synchronous>, transform_indices = @transform_3, window_bounds = array<i64: 130, 128>}, {pipeline_mode = #tpu.pipeline_mode<synchronous>, transform_indices = @transform_4, window_bounds = array<i64: 130, 128>}, {pipeline_mode = #tpu.pipeline_mode<synchronous>, transform_indices = @transform_5, window_bounds = array<i64: 130, 128>}, {pipeline_mode = #tpu.pipeline_mode<synchronous>, transform_indices = @transform_6, window_bounds = array<i64: 1, 128>}, {pipeline_mode = #tpu.pipeline_mode<synchronous>, transform_indices = @transform_7, window_bounds = array<i64: 128, 64>}, {pipeline_mode = #tpu.pipeline_mode<synchronous>, transform_indices = @transform_8, window_bounds = array<i64: 1, 64>}, {pipeline_mode = #tpu.pipeline_mode<synchronous>, transform_indices = @transform_9, window_bounds = array<i64: 64, 64>}, {pipeline_mode = #tpu.pipeline_mode<synchronous>, transform_indices = @transform_10, window_bounds = array<i64: 1, 64>}, {pipeline_mode = #tpu.pipeline_mode<synchronous>, transform_indices = @transform_11, window_bounds = array<i64: 64, 32>}, {pipeline_mode = #tpu.pipeline_mode<synchronous>, transform_indices = @transform_12, window_bounds = array<i64: 1, 32>}, {pipeline_mode = #tpu.pipeline_mode<synchronous>, transform_indices = @transform_13, window_bounds = array<i64: 32, 32>}, {pipeline_mode = #tpu.pipeline_mode<synchronous>, transform_indices = @transform_14, window_bounds = array<i64: 1, 32>}, {pipeline_mode = #tpu.pipeline_mode<synchronous>, transform_indices = @transform_15, window_bounds = array<i64: 32, 2>}, {pipeline_mode = #tpu.pipeline_mode<synchronous>, transform_indices = @transform_16, window_bounds = array<i64: 1, 2>}, {transform_indices = @transform_17, window_bounds = array<i64: 2, 2>}]} {
    %c0 = arith.constant 0 : index
    %c0_0 = arith.constant 0 : index
    %0 = vector.load %arg1[%c0, %c0_0] : memref<2x130xf32, #tpu.memory_space<vmem>>, vector<2x130xf32>
    %c0_1 = arith.constant 0 : index
    %c0_2 = arith.constant 0 : index
    %1 = vector.load %arg4[%c0_1, %c0_2] : memref<130x128xf32, #tpu.memory_space<vmem>>, vector<130x128xf32>
    %cst = arith.constant dense<0.000000e+00> : vector<2x128xf32>
    %2 = tpu.matmul %0, %1, %cst {dimension_numbers = #tpu.dot_dimension_numbers<[1], [0], [0], [1], [0, 0, 1, 1], [], []>} : vector<2x130xf32>, vector<130x128xf32>, vector<2x128xf32> -> vector<2x128xf32>
    %c0_3 = arith.constant 0 : index
    %c0_4 = arith.constant 0 : index
    %3 = vector.load %arg2[%c0_3, %c0_4] : memref<2x130xf32, #tpu.memory_space<vmem>>, vector<2x130xf32>
    %c0_5 = arith.constant 0 : index
    %c0_6 = arith.constant 0 : index
    %4 = vector.load %arg5[%c0_5, %c0_6] : memref<130x128xf32, #tpu.memory_space<vmem>>, vector<130x128xf32>
    %cst_7 = arith.constant dense<0.000000e+00> : vector<2x128xf32>
    %5 = tpu.matmul %3, %4, %cst_7 {dimension_numbers = #tpu.dot_dimension_numbers<[1], [0], [0], [1], [0, 0, 1, 1], [], []>} : vector<2x130xf32>, vector<130x128xf32>, vector<2x128xf32> -> vector<2x128xf32>
    %6 = arith.addf %2, %5 : vector<2x128xf32>
    %c0_8 = arith.constant 0 : index
    %c0_9 = arith.constant 0 : index
    %7 = vector.load %arg3[%c0_8, %c0_9] : memref<2x130xf32, #tpu.memory_space<vmem>>, vector<2x130xf32>
    %c0_10 = arith.constant 0 : index
    %c0_11 = arith.constant 0 : index
    %8 = vector.load %arg6[%c0_10, %c0_11] : memref<130x128xf32, #tpu.memory_space<vmem>>, vector<130x128xf32>
    %cst_12 = arith.constant dense<0.000000e+00> : vector<2x128xf32>
    %9 = tpu.matmul %7, %8, %cst_12 {dimension_numbers = #tpu.dot_dimension_numbers<[1], [0], [0], [1], [0, 0, 1, 1], [], []>} : vector<2x130xf32>, vector<130x128xf32>, vector<2x128xf32> -> vector<2x128xf32>
    %10 = arith.addf %6, %9 : vector<2x128xf32>
    %c0_13 = arith.constant 0 : index
    %c0_14 = arith.constant 0 : index
    %11 = vector.load %arg7[%c0_13, %c0_14] : memref<1x128xf32, #tpu.memory_space<vmem>>, vector<1x128xf32>
    %12 = vector.broadcast %11 : vector<1x128xf32> to vector<2x128xf32>
    %13 = arith.addf %10, %12 : vector<2x128xf32>
    %cst_15 = arith.constant 0.000000e+00 : f32
    %14 = vector.broadcast %cst_15 : f32 to vector<2x128xf32>
    %15 = arith.cmpf ogt, %13, %14 : vector<2x128xf32>
    %cst_16 = arith.constant 0.000000e+00 : f32
    %16 = vector.broadcast %cst_16 : f32 to vector<2x128xf32>
    %17 = arith.minimumf %13, %16 : vector<2x128xf32>
    %18 = math.exp %17 : vector<2x128xf32>
    %cst_17 = arith.constant 1.000000e+00 : f32
    %19 = vector.broadcast %cst_17 : f32 to vector<2x128xf32>
    %20 = arith.subf %18, %19 : vector<2x128xf32>
    %21 = arith.select %15, %13, %20 : vector<2x128xi1>, vector<2x128xf32>
    %c0_18 = arith.constant 0 : index
    %c0_19 = arith.constant 0 : index
    %22 = vector.load %arg8[%c0_18, %c0_19] : memref<128x64xf32, #tpu.memory_space<vmem>>, vector<128x64xf32>
    %cst_20 = arith.constant dense<0.000000e+00> : vector<2x64xf32>
    %23 = tpu.matmul %21, %22, %cst_20 {dimension_numbers = #tpu.dot_dimension_numbers<[1], [0], [0], [1], [0, 0, 1, 1], [], []>} : vector<2x128xf32>, vector<128x64xf32>, vector<2x64xf32> -> vector<2x64xf32>
    %c0_21 = arith.constant 0 : index
    %c0_22 = arith.constant 0 : index
    %24 = vector.load %arg9[%c0_21, %c0_22] : memref<1x64xf32, #tpu.memory_space<vmem>>, vector<1x64xf32>
    %25 = vector.broadcast %24 : vector<1x64xf32> to vector<2x64xf32>
    %26 = arith.addf %23, %25 : vector<2x64xf32>
    %cst_23 = arith.constant 0.000000e+00 : f32
    %27 = vector.broadcast %cst_23 : f32 to vector<2x64xf32>
    %28 = arith.cmpf ogt, %26, %27 : vector<2x64xf32>
    %cst_24 = arith.constant 0.000000e+00 : f32
    %29 = vector.broadcast %cst_24 : f32 to vector<2x64xf32>
    %30 = arith.minimumf %26, %29 : vector<2x64xf32>
    %31 = math.exp %30 : vector<2x64xf32>
    %cst_25 = arith.constant 1.000000e+00 : f32
    %32 = vector.broadcast %cst_25 : f32 to vector<2x64xf32>
    %33 = arith.subf %31, %32 : vector<2x64xf32>
    %34 = arith.select %28, %26, %33 : vector<2x64xi1>, vector<2x64xf32>
    %c0_26 = arith.constant 0 : index
    %c0_27 = arith.constant 0 : index
    %35 = vector.load %arg10[%c0_26, %c0_27] : memref<64x64xf32, #tpu.memory_space<vmem>>, vector<64x64xf32>
    %cst_28 = arith.constant dense<0.000000e+00> : vector<2x64xf32>
    %36 = tpu.matmul %34, %35, %cst_28 {dimension_numbers = #tpu.dot_dimension_numbers<[1], [0], [0], [1], [0, 0, 1, 1], [], []>} : vector<2x64xf32>, vector<64x64xf32>, vector<2x64xf32> -> vector<2x64xf32>
    %c0_29 = arith.constant 0 : index
    %c0_30 = arith.constant 0 : index
    %37 = vector.load %arg11[%c0_29, %c0_30] : memref<1x64xf32, #tpu.memory_space<vmem>>, vector<1x64xf32>
    %38 = vector.broadcast %37 : vector<1x64xf32> to vector<2x64xf32>
    %39 = arith.addf %36, %38 : vector<2x64xf32>
    %cst_31 = arith.constant 0.000000e+00 : f32
    %40 = vector.broadcast %cst_31 : f32 to vector<2x64xf32>
    %41 = arith.cmpf ogt, %39, %40 : vector<2x64xf32>
    %cst_32 = arith.constant 0.000000e+00 : f32
    %42 = vector.broadcast %cst_32 : f32 to vector<2x64xf32>
    %43 = arith.minimumf %39, %42 : vector<2x64xf32>
    %44 = math.exp %43 : vector<2x64xf32>
    %cst_33 = arith.constant 1.000000e+00 : f32
    %45 = vector.broadcast %cst_33 : f32 to vector<2x64xf32>
    %46 = arith.subf %44, %45 : vector<2x64xf32>
    %47 = arith.select %41, %39, %46 : vector<2x64xi1>, vector<2x64xf32>
    %c0_34 = arith.constant 0 : index
    %c0_35 = arith.constant 0 : index
    %48 = vector.load %arg12[%c0_34, %c0_35] : memref<64x32xf32, #tpu.memory_space<vmem>>, vector<64x32xf32>
    %cst_36 = arith.constant dense<0.000000e+00> : vector<2x32xf32>
    %49 = tpu.matmul %47, %48, %cst_36 {dimension_numbers = #tpu.dot_dimension_numbers<[1], [0], [0], [1], [0, 0, 1, 1], [], []>} : vector<2x64xf32>, vector<64x32xf32>, vector<2x32xf32> -> vector<2x32xf32>
    %c0_37 = arith.constant 0 : index
    %c0_38 = arith.constant 0 : index
    %50 = vector.load %arg13[%c0_37, %c0_38] : memref<1x32xf32, #tpu.memory_space<vmem>>, vector<1x32xf32>
    %51 = vector.broadcast %50 : vector<1x32xf32> to vector<2x32xf32>
    %52 = arith.addf %49, %51 : vector<2x32xf32>
    %cst_39 = arith.constant 0.000000e+00 : f32
    %53 = vector.broadcast %cst_39 : f32 to vector<2x32xf32>
    %54 = arith.cmpf ogt, %52, %53 : vector<2x32xf32>
    %cst_40 = arith.constant 0.000000e+00 : f32
    %55 = vector.broadcast %cst_40 : f32 to vector<2x32xf32>
    %56 = arith.minimumf %52, %55 : vector<2x32xf32>
    %57 = math.exp %56 : vector<2x32xf32>
    %cst_41 = arith.constant 1.000000e+00 : f32
    %58 = vector.broadcast %cst_41 : f32 to vector<2x32xf32>
    %59 = arith.subf %57, %58 : vector<2x32xf32>
    %60 = arith.select %54, %52, %59 : vector<2x32xi1>, vector<2x32xf32>
    %c0_42 = arith.constant 0 : index
    %c0_43 = arith.constant 0 : index
    %61 = vector.load %arg14[%c0_42, %c0_43] : memref<32x32xf32, #tpu.memory_space<vmem>>, vector<32x32xf32>
    %cst_44 = arith.constant dense<0.000000e+00> : vector<2x32xf32>
    %62 = tpu.matmul %60, %61, %cst_44 {dimension_numbers = #tpu.dot_dimension_numbers<[1], [0], [0], [1], [0, 0, 1, 1], [], []>} : vector<2x32xf32>, vector<32x32xf32>, vector<2x32xf32> -> vector<2x32xf32>
    %c0_45 = arith.constant 0 : index
    %c0_46 = arith.constant 0 : index
    %63 = vector.load %arg15[%c0_45, %c0_46] : memref<1x32xf32, #tpu.memory_space<vmem>>, vector<1x32xf32>
    %64 = vector.broadcast %63 : vector<1x32xf32> to vector<2x32xf32>
    %65 = arith.addf %62, %64 : vector<2x32xf32>
    %cst_47 = arith.constant 0.000000e+00 : f32
    %66 = vector.broadcast %cst_47 : f32 to vector<2x32xf32>
    %67 = arith.cmpf ogt, %65, %66 : vector<2x32xf32>
    %cst_48 = arith.constant 0.000000e+00 : f32
    %68 = vector.broadcast %cst_48 : f32 to vector<2x32xf32>
    %69 = arith.minimumf %65, %68 : vector<2x32xf32>
    %70 = math.exp %69 : vector<2x32xf32>
    %cst_49 = arith.constant 1.000000e+00 : f32
    %71 = vector.broadcast %cst_49 : f32 to vector<2x32xf32>
    %72 = arith.subf %70, %71 : vector<2x32xf32>
    %73 = arith.select %67, %65, %72 : vector<2x32xi1>, vector<2x32xf32>
    %c0_50 = arith.constant 0 : index
    %c0_51 = arith.constant 0 : index
    %74 = vector.load %arg16[%c0_50, %c0_51] : memref<32x2xf32, #tpu.memory_space<vmem>>, vector<32x2xf32>
    %cst_52 = arith.constant dense<0.000000e+00> : vector<2x2xf32>
    %75 = tpu.matmul %73, %74, %cst_52 {dimension_numbers = #tpu.dot_dimension_numbers<[1], [0], [0], [1], [0, 0, 1, 1], [], []>} : vector<2x32xf32>, vector<32x2xf32>, vector<2x2xf32> -> vector<2x2xf32>
    %c0_53 = arith.constant 0 : index
    %c0_54 = arith.constant 0 : index
    %76 = vector.load %arg17[%c0_53, %c0_54] : memref<1x2xf32, #tpu.memory_space<vmem>>, vector<1x2xf32>
    %77 = vector.broadcast %76 : vector<1x2xf32> to vector<2x2xf32>
    %78 = arith.addf %75, %77 : vector<2x2xf32>
    %c0_55 = arith.constant 0 : index
    %c0_56 = arith.constant 0 : index
    %79 = vector.load %arg18[%c0_55, %c0_56] : memref<2x2xf32, #tpu.memory_space<vmem>>, vector<2x2xf32>
    tpu.vector_store %arg18[%c0_55, %c0_56], %78 {strides = array<i32>} : memref<2x2xf32, #tpu.memory_space<vmem>>, vector<2x2xf32>,
    return
  }
  func.func @transform_0(%arg0: i32) -> (i32, i32) {
    %c0_i32 = arith.constant 0 : i32
    %c0_i32_0 = arith.constant 0 : i32
    return %arg0, %c0_i32 : i32, i32
  }
  func.func @transform_1(%arg0: i32) -> (i32, i32) {
    %c0_i32 = arith.constant 0 : i32
    %c0_i32_0 = arith.constant 0 : i32
    return %arg0, %c0_i32 : i32, i32
  }
  func.func @transform_2(%arg0: i32) -> (i32, i32) {
    %c0_i32 = arith.constant 0 : i32
    %c0_i32_0 = arith.constant 0 : i32
    return %arg0, %c0_i32 : i32, i32
  }
  func.func @transform_3(%arg0: i32) -> (i32, i32) {
    %c0_i32 = arith.constant 0 : i32
    %c0_i32_0 = arith.constant 0 : i32
    %c0_i32_1 = arith.constant 0 : i32
    return %c0_i32, %c0_i32_0 : i32, i32
  }
  func.func @transform_4(%arg0: i32) -> (i32, i32) {
    %c0_i32 = arith.constant 0 : i32
    %c0_i32_0 = arith.constant 0 : i32
    %c0_i32_1 = arith.constant 0 : i32
    return %c0_i32, %c0_i32_0 : i32, i32
  }
  func.func @transform_5(%arg0: i32) -> (i32, i32) {
    %c0_i32 = arith.constant 0 : i32
    %c0_i32_0 = arith.constant 0 : i32
    %c0_i32_1 = arith.constant 0 : i32
    return %c0_i32, %c0_i32_0 : i32, i32
  }
  func.func @transform_6(%arg0: i32) -> (i32, i32) {
    %c0_i32 = arith.constant 0 : i32
    %c0_i32_0 = arith.constant 0 : i32
    %c0_i32_1 = arith.constant 0 : i32
    return %c0_i32, %c0_i32_0 : i32, i32
  }
  func.func @transform_7(%arg0: i32) -> (i32, i32) {
    %c0_i32 = arith.constant 0 : i32
    %c0_i32_0 = arith.constant 0 : i32
    %c0_i32_1 = arith.constant 0 : i32
    return %c0_i32, %c0_i32_0 : i32, i32
  }
  func.func @transform_8(%arg0: i32) -> (i32, i32) {
    %c0_i32 = arith.constant 0 : i32
    %c0_i32_0 = arith.constant 0 : i32
    %c0_i32_1 = arith.constant 0 : i32
    return %c0_i32, %c0_i32_0 : i32, i32
  }
  func.func @transform_9(%arg0: i32) -> (i32, i32) {
    %c0_i32 = arith.constant 0 : i32
    %c0_i32_0 = arith.constant 0 : i32
    %c0_i32_1 = arith.constant 0 : i32
    return %c0_i32, %c0_i32_0 : i32, i32
  }
  func.func @transform_10(%arg0: i32) -> (i32, i32) {
    %c0_i32 = arith.constant 0 : i32
    %c0_i32_0 = arith.constant 0 : i32
    %c0_i32_1 = arith.constant 0 : i32
    return %c0_i32, %c0_i32_0 : i32, i32
  }
  func.func @transform_11(%arg0: i32) -> (i32, i32) {
    %c0_i32 = arith.constant 0 : i32
    %c0_i32_0 = arith.constant 0 : i32
    %c0_i32_1 = arith.constant 0 : i32
    return %c0_i32, %c0_i32_0 : i32, i32
  }
  func.func @transform_12(%arg0: i32) -> (i32, i32) {
    %c0_i32 = arith.constant 0 : i32
    %c0_i32_0 = arith.constant 0 : i32
    %c0_i32_1 = arith.constant 0 : i32
    return %c0_i32, %c0_i32_0 : i32, i32
  }
  func.func @transform_13(%arg0: i32) -> (i32, i32) {
    %c0_i32 = arith.constant 0 : i32
    %c0_i32_0 = arith.constant 0 : i32
    %c0_i32_1 = arith.constant 0 : i32
    return %c0_i32, %c0_i32_0 : i32, i32
  }
  func.func @transform_14(%arg0: i32) -> (i32, i32) {
    %c0_i32 = arith.constant 0 : i32
    %c0_i32_0 = arith.constant 0 : i32
    %c0_i32_1 = arith.constant 0 : i32
    return %c0_i32, %c0_i32_0 : i32, i32
  }
  func.func @transform_15(%arg0: i32) -> (i32, i32) {
    %c0_i32 = arith.constant 0 : i32
    %c0_i32_0 = arith.constant 0 : i32
    %c0_i32_1 = arith.constant 0 : i32
    return %c0_i32, %c0_i32_0 : i32, i32
  }
  func.func @transform_16(%arg0: i32) -> (i32, i32) {
    %c0_i32 = arith.constant 0 : i32
    %c0_i32_0 = arith.constant 0 : i32
    %c0_i32_1 = arith.constant 0 : i32
    return %c0_i32, %c0_i32_0 : i32, i32
  }
  func.func @transform_17(%arg0: i32) -> (i32, i32) {
    %c0_i32 = arith.constant 0 : i32
    %c0_i32_0 = arith.constant 0 : i32
    return %arg0, %c0_i32 : i32, i32
  }
}

</mosaic_0001>

<bundles_post_ra>
// kernel: neuralnet_forward.1
= control target key start
LH: loop header
LB: loop body
LE: loop exit
PB: predicated region body
PF: predicated region fallthrough
CT: control target
= control target key end

     0   :  { %s1674_s0 = inlined_call_operand.vmem [shape: f32[2,130], index: 0, kind: input, shape index: {}]   ;;  %s1675_s1 = inlined_call_operand.vmem [shape: f32[2,130], index: 1, kind: input, shape index: {}]   ;;  %s1676_s2 = inlined_call_operand.vmem [shape: f32[2,130], index: 2, kind: input, shape index: {}]   ;;  %s1677_s3 = inlined_call_operand.vmem [shape: f32[130,128], index: 3, kind: input, shape index: {}]   ;;  %s1678_s4 = inlined_call_operand.vmem [shape: f32[130,128], index: 4, kind: input, shape index: {}]   ;;  %s1679_s5 = inlined_call_operand.vmem [shape: f32[130,128], index: 5, kind: input, shape index: {}]   ;;  %s1680_s6 = inlined_call_operand.vmem [shape: f32[1,128], index: 6, kind: input, shape index: {}]   ;;  %s1681_s7 = inlined_call_operand.vmem [shape: f32[128,64], index: 7, kind: input, shape index: {}]   ;;  %s1682_s8 = inlined_call_operand.vmem [shape: f32[1,64], index: 8, kind: input, shape index: {}]   ;;  %s1683_s9 = inlined_call_operand.vmem [shape: f32[64,64], index: 9, kind: input, shape index: {}]   ;;  %s1684_s10 = inlined_call_operand.vmem [shape: f32[1,64], index: 10, kind: input, shape index: {}]   ;;  %s1685_s11 = inlined_call_operand.vmem [shape: f32[64,32], index: 11, kind: input, shape index: {}]   ;;  %s1686_s12 = inlined_call_operand.vmem [shape: f32[1,32], index: 12, kind: input, shape index: {}]   ;;  %s1687_s13 = inlined_call_operand.vmem [shape: f32[32,32], index: 13, kind: input, shape index: {}]   ;;  %s1688_s14 = inlined_call_operand.vmem [shape: f32[1,32], index: 14, kind: input, shape index: {}]   ;;  %s1689_s15 = inlined_call_operand.vmem [shape: f32[32,2], index: 15, kind: input, shape index: {}]   ;;  %s1690_s16 = inlined_call_operand.vmem [shape: f32[1,2], index: 16, kind: input, shape index: {}]   ;;  %s1691_s17 = inlined_call_operand.hbm [shape: f32[2,2], index: 17, kind: output, shape index: {}]  }
   0x1   :  { %1692 = sst [smem:[#allocation5_spill]] %s1674_s0 }
   0x2   :  { %1693 = sst [smem:[#allocation6_spill]] %s1675_s1 }
   0x3   :  { %v76_v0 = vld [vmem:[%s1678_s4] sm:$0xff]  ;;  %v77_v1 = vld [vmem:[%s1678_s4 + $0x8] sm:$0xff]  ;;  %v1196_v3 = vmov 0.0|0.0   ;;  %v78_v6 = vld [vmem:[%s1678_s4 + $0x10] sm:$0xff]  ;;  %s1694_s28 = sld [smem:[#allocation6_spill]]  ;;  %vm103_vm0 = vcmask 15360  }
   0x4   :  { %v58_v2 = vld [vmem:[%s1677_s3] sm:$0xff]  ;;  %1026 = vmatprep.subr.bf16.mxu0 %v1196_v3  ;;  %v1027_v4 = vpack.c.bf16 %v77_v1, %v76_v0  ;;  %1050 = vmatprep.subr.bf16.mxu1 %v1196_v3  ;;  %v59_v5 = vld [vmem:[%s1677_s3 + $0x8] sm:$0xff]  ;;  %v79_v7 = vld [vmem:[%s1678_s4 + $0x18] sm:$0xff]  ;;  %s1695_s20 = sld [smem:[#allocation5_spill]] }
   0x5   :  { %v1051_v8 = vpack.c.bf16 %v59_v5, %v58_v2  ;;  %v60_v9 = vld [vmem:[%s1677_s3 + $0x10] sm:$0xff]  ;;  %v61_v10 = vld [vmem:[%s1677_s3 + $0x18] sm:$0xff]  ;;  %v1030_v11 = vpack.c.bf16 %v79_v7, %v78_v6  ;;  %v80_v13 = vld [vmem:[%s1678_s4 + $0x20] sm:$0xff] }
   0x6   :  { %1028 = vmatpush1.bf16.msra.mxu0 %v1027_v4  ;;  %v1054_v12 = vpack.c.bf16 %v61_v10, %v60_v9  ;;  %v81_v14 = vld [vmem:[%s1678_s4 + $0x28] sm:$0xff]  ;;  %v62_v15 = vld [vmem:[%s1677_s3 + $0x20] sm:$0xff]  ;;  %v82_v19 = vld [vmem:[%s1678_s4 + $0x30] sm:$0xff] }
   0x7   :  { %1052 = vmatpush1.bf16.msra.mxu1 %v1051_v8  ;;  %1029 = vmatprep.subr.bf16.mxu0 %v1196_v3  ;;  %v63_v16 = vld [vmem:[%s1677_s3 + $0x28] sm:$0xff]  ;;  %v1033_v17 = vpack.c.bf16 %v81_v14, %v80_v13  ;;  %v83_v20 = vld [vmem:[%s1678_s4 + $0x38] sm:$0xff]  ;;  %v64_v21 = vld [vmem:[%s1677_s3 + $0x30] sm:$0xff] }
   0x8   :  { %1053 = vmatprep.subr.bf16.mxu1 %v1196_v3  ;;  %v1057_v18 = vpack.c.bf16 %v63_v16, %v62_v15  ;;  %v65_v22 = vld [vmem:[%s1677_s3 + $0x38] sm:$0xff]  ;;  %v1036_v23 = vpack.c.bf16 %v83_v20, %v82_v19  ;;  %v84_v26 = vld [vmem:[%s1678_s4 + $0x40] sm:$0xff]  ;;  %v85_v27 = vld [vmem:[%s1678_s4 + $0x48] sm:$0xff] }
   0x9   :  { %v1347_v24 = vld.sshfl [vmem:[%s1694_s28] sm:$0x33 pattern:$0x76325410]  ;;  %v1060_v25 = vpack.c.bf16 %v65_v22, %v64_v21  ;;  %v67_v31 = vld [vmem:[%s1677_s3 + $0x48] sm:$0xff]  ;;  %v1039_v33 = vpack.c.bf16 %v85_v27, %v84_v26  ;;  %v86_v35 = vld [vmem:[%s1678_s4 + $0x50] sm:$0xff] }
   0xa   :  { %1031 = vmatpush1.bf16.msra.mxu0 %v1030_v11  ;;  %v101_v28 = vcombine.high %v1347_v24, %v1347_v24  ;;  %v865_v29 = vld.sshfl [vmem:[%s1695_s20] sm:$0x33 pattern:$0x76325410]  ;;  %v87_v36 = vld [vmem:[%s1678_s4 + $0x58] sm:$0xff]  ;;  %v68_v37 = vld [vmem:[%s1677_s3 + $0x50] sm:$0xff] }
   0xb   :  { %1055 = vmatpush1.bf16.msra.mxu1 %v1054_v12  ;;  %1032 = vmatprep.subr.bf16.mxu0 %v1196_v3  ;;  %v66_v30 = vld [vmem:[%s1677_s3 + $0x40] sm:$0xff]  ;;  %v188_v32 = vcombine.high %v865_v29, %v865_v29  ;;  %v69_v38 = vld [vmem:[%s1677_s3 + $0x58] sm:$0xff] }
   0xc   :  { %1056 = vmatprep.subr.bf16.mxu1 %v1196_v3  ;;  %864 = vmatprep.mubr.msk.f32.mxu0 %vm103_vm0, %v101_v28  ;;  %v1063_v34 = vpack.c.bf16 %v67_v31, %v66_v30 }
   0xd   :  { %867 = vmatprep.mubr.msk.f32.mxu1 %vm103_vm0, %v188_v32 }
   0xe   :  { %1034 = vmatpush1.bf16.msra.mxu0 %v1033_v17 }
   0xf   :  { %1058 = vmatpush1.bf16.msra.mxu1 %v1057_v18  ;;  %1035 = vmatprep.subr.bf16.mxu0 %v1196_v3 }
  0x10   :  { %1059 = vmatprep.subr.bf16.mxu1 %v1196_v3 }
  0x12   :  { %1037 = vmatpush1.bf16.msra.mxu0 %v1036_v23 }
  0x13   :  { %1061 = vmatpush1.bf16.msra.mxu1 %v1060_v25  ;;  %1038 = vmatprep.subr.bf16.mxu0 %v1196_v3 }
  0x14   :  { %1062 = vmatprep.subr.bf16.mxu1 %v1196_v3 }
  0x15   :  { %22 = vsyncpa [#allocation3], 0  ;;  %v1042_v39 = vpack.c.bf16 %v87_v36, %v86_v35  ;;  %v1066_v40 = vpack.c.bf16 %v69_v38, %v68_v37  ;;  %v88_v41 = vld [vmem:[%s1678_s4 + $0x60] sm:$0xff]  ;;  %v89_v42 = vld [vmem:[%s1678_s4 + $0x68] sm:$0xff]  ;;  %v1197_v56 = vmov 0.0   ;;  %vm106_vm1 = vcmask 1041408  }
  0x16   :  { %1040 = vmatpush1.bf16.msra.mxu0 %v1039_v33  ;;  %v70_v43 = vld [vmem:[%s1677_s3 + $0x60] sm:$0xff]  ;;  %v71_v44 = vld [vmem:[%s1677_s3 + $0x68] sm:$0xff]  ;;  %v1045_v45 = vpack.c.bf16 %v89_v42, %v88_v41  ;;  %v90_v47 = vld [vmem:[%s1678_s4 + $0x70] sm:$0xff]  ;;  %vm1198_vm2 = vmmov 0   ;;  %vm497_vm4 = vcmask 523264   ;;  %vm682_vm7 = vcmask 261120  }
  0x17   :  { %1064 = vmatpush1.bf16.msra.mxu1 %v1063_v34  ;;  %1041 = vmatprep.subr.bf16.mxu0 %v1196_v3  ;;  %v1069_v46 = vpack.c.bf16 %v71_v44, %v70_v43  ;;  %v91_v48 = vld [vmem:[%s1678_s4 + $0x78] sm:$0xff]  ;;  %v72_v49 = vld [vmem:[%s1677_s3 + $0x70] sm:$0xff]  ;;  %v266_v53 = vld [vmem:[%s1679_s5] sm:$0xff]  ;;  %s1199_s24 = smov [#allocation2]   ;;  %vm846_vm10 = vcmask 9216  }
  0x18   :  { %1065 = vmatprep.subr.bf16.mxu1 %v1196_v3  ;;  %v73_v50 = vld [vmem:[%s1677_s3 + $0x78] sm:$0xff]  ;;  %v1048_v51 = vpack.c.bf16 %v91_v48, %v90_v47  ;;  %v267_v54 = vld [vmem:[%s1679_s5 + $0x8] sm:$0xff]  ;;  %v868_v55 = vld.sshfl [vmem:[%s1676_s2] sm:$0x33 pattern:$0x76325410] }
  0x19   :  { %v1072_v52 = vpack.c.bf16 %v73_v50, %v72_v49  ;;  %v92_v57 = vld [vmem:[%s1678_s4 + $0x80] sm:$0x3]  ;;  %v1075_v59 = vpack.c.bf16 %v267_v54, %v266_v53  ;;  %v291_v60 = vcombine.high %v868_v55, %v868_v55  ;;  %v268_v61 = vld [vmem:[%s1679_s5 + $0x10] sm:$0xff]  ;;  %v269_v62 = vld [vmem:[%s1679_s5 + $0x18] sm:$0xff]  ;;  %s854_s25 = sshll.u32 %s1199_s24, 4  ;;  %s855_s25 = int_to_ptr.vmem [resolvable:$true] %s854_s25 }
  0x1a   :  { %1043 = vmatpush1.bf16.msra.mxu0 %v1042_v39  ;;  %v74_v58 = vld [vmem:[%s1677_s3 + $0x80] sm:$0x3]  ;;  %v1078_v63 = vpack.c.bf16 %v269_v62, %v268_v61  ;;  %v271_v1 = vld [vmem:[%s1679_s5 + $0x28] sm:$0xff]  ;;  %v272_v4 = vld [vmem:[%s1679_s5 + $0x30] sm:$0xff]  ;;  %p1177_p1 = scmp.lt.s32.totalorder %s855_s25, %s855_s25 }
  0x1b   :  { %1067 = vmatpush1.bf16.msra.mxu1 %v1066_v40  ;;  %1044 = vmatprep.subr.bf16.mxu0 %v1196_v3  ;;  %v270_v0 = vld [vmem:[%s1679_s5 + $0x20] sm:$0xff]  ;;  %v273_v5 = vld [vmem:[%s1679_s5 + $0x38] sm:$0xff]  ;;  %v275_v8 = vld [vmem:[%s1679_s5 + $0x48] sm:$0xff] }
  0x1c   :  { %1068 = vmatprep.subr.bf16.mxu1 %v1196_v3  ;;  %v1081_v2 = vpack.c.bf16 %v271_v1, %v270_v0  ;;  %v1084_v6 = vpack.c.bf16 %v273_v5, %v272_v4  ;;  %v274_v7 = vld [vmem:[%s1679_s5 + $0x40] sm:$0xff]  ;;  %v276_v10 = vld [vmem:[%s1679_s5 + $0x50] sm:$0xff]  ;;  %v277_v11 = vld [vmem:[%s1679_s5 + $0x58] sm:$0xff] }
  0x1d   :  { %v1087_v9 = vpack.c.bf16 %v275_v8, %v274_v7  ;;  %v1090_v12 = vpack.c.bf16 %v277_v11, %v276_v10  ;;  %v278_v13 = vld [vmem:[%s1679_s5 + $0x60] sm:$0xff]  ;;  %v279_v14 = vld [vmem:[%s1679_s5 + $0x68] sm:$0xff]  ;;  %v280_v16 = vld [vmem:[%s1679_s5 + $0x70] sm:$0xff] }
  0x1e   :  { %1046 = vmatpush1.bf16.msra.mxu0 %v1045_v45  ;;  %v1093_v15 = vpack.c.bf16 %v279_v14, %v278_v13  ;;  %v281_v17 = vld [vmem:[%s1679_s5 + $0x78] sm:$0xff]  ;;  %v282_v19 = vld [vmem:[%s1679_s5 + $0x80] sm:$0x3]  ;;  %v384_v21 = vld [vmem:[%s1681_s7 + $0x8] sm:$0xff] }
  0x1f   :  { %1070 = vmatpush1.bf16.msra.mxu1 %v1069_v46  ;;  %1047 = vmatprep.subr.bf16.mxu0 %v1196_v3  ;;  %v1096_v18 = vpack.c.bf16 %v281_v17, %v280_v16  ;;  %v383_v20 = vld [vmem:[%s1681_s7] sm:$0xff]  ;;  %v385_v22 = vld [vmem:[%s1681_s7 + $0x10] sm:$0xff]  ;;  %v388_v27 = vld [vmem:[%s1681_s7 + $0x28] sm:$0xff] }
  0x20   :  { %1071 = vmatprep.subr.bf16.mxu1 %v1196_v3  ;;  %v1099_v23 = vpack.c.bf16 %v384_v21, %v383_v20  ;;  %v387_v26 = vld [vmem:[%s1681_s7 + $0x20] sm:$0xff]  ;;  %v390_v30 = vld [vmem:[%s1681_s7 + $0x38] sm:$0xff]  ;;  %v392_v33 = vld [vmem:[%s1681_s7 + $0x48] sm:$0xff] }
  0x21   :  { %v1105_v28 = vpack.c.bf16 %v388_v27, %v387_v26  ;;  %v391_v32 = vld [vmem:[%s1681_s7 + $0x40] sm:$0xff]  ;;  %v393_v35 = vld [vmem:[%s1681_s7 + $0x50] sm:$0xff]  ;;  %v394_v36 = vld [vmem:[%s1681_s7 + $0x58] sm:$0xff] }
  0x22   :  { %1049 = vmatpush1.bf16.msra.mxu0 %v1048_v51  ;;  %v1111_v34 = vpack.c.bf16 %v392_v33, %v391_v32  ;;  %v395_v37 = vld [vmem:[%s1681_s7 + $0x60] sm:$0xff]  ;;  %v1114_v38 = vpack.c.bf16 %v394_v36, %v393_v35  ;;  %v396_v39 = vld [vmem:[%s1681_s7 + $0x68] sm:$0xff]  ;;  %v397_v41 = vld [vmem:[%s1681_s7 + $0x70] sm:$0xff] }
  0x23   :  { %1073 = vmatpush1.bf16.msra.mxu1 %v1072_v52  ;;  %142 = vmatprep.subr.mxu0 %v1197_v56  ;;  %v1117_v40 = vpack.c.bf16 %v396_v39, %v395_v37  ;;  %v398_v42 = vld [vmem:[%s1681_s7 + $0x78] sm:$0xff]  ;;  %v871_v50 = vld [vmem:[%s1680_s6] ss:$0 sm:$0xff]  ;;  %v483_v61 = vld [vmem:[%s1683_s9 + $0x8] sm:$0xff] }
  0x24   :  { %227 = vmatprep.subr.mxu1 %v1197_v56  ;;  %v1120_v43 = vpack.c.bf16 %v398_v42, %v397_v41  ;;  %v485_v0 = vld [vmem:[%s1683_s9 + $0x18] sm:$0xff]  ;;  %v487_v4 = vld [vmem:[%s1683_s9 + $0x28] sm:$0xff]  ;;  %v579_v21 = vld [vmem:[%s1685_s11 + $0x10] sm:$0xff] }
  0x25   :  { %v489_v7 = vld [vmem:[%s1683_s9 + $0x38] sm:$0xff]  ;;  %v583_v27 = vld [vmem:[%s1685_s11 + $0x30] sm:$0xff]  ;;  %v671_v39 = vld [vmem:[%s1687_s13] sm:$0xff] }
  0x26   :  { %863 = vmatpush1.msk.msra.mxu0 %vm106_vm1, %v92_v57  ;;  %v673_v42 = vld [vmem:[%s1687_s13 + $0x10] sm:$0xff] }
  0x27   :  { %175 = vmatmul.mubr.f32.vlgmr.msra.gmra.mrb[0].mxu0 %v1347_v24  ;;  %866 = vmatpush1.msk.msra.mxu1 %vm106_vm1, %v74_v58  ;;  %v386_v24 = vld [vmem:[%s1681_s7 + $0x18] sm:$0xff] }
  0x28   :  { %1074 = vmatprep.subr.bf16.mxu0 %v1196_v3  ;;  %260 = vmatmul.mubr.f32.vlgmr.msra.gmra.mrb[0].mxu1 %v865_v29  ;;  %v1102_v25 = vpack.c.bf16 %v386_v24, %v385_v22  ;;  %v389_v29 = vld [vmem:[%s1681_s7 + $0x30] sm:$0xff]  ;;  %v580_v22 = vld [vmem:[%s1685_s11 + $0x18] sm:$0xff]  ;;  %v581_v24 = vld [vmem:[%s1685_s11 + $0x20] sm:$0xff] }
  0x29   :  { %1076 = vmatpush1.bf16.msra.mxu0 %v1075_v59  ;;  %870 = vmatprep.mubr.msk.f32.mxu0 %vm103_vm0, %v291_v60  ;;  %v1108_v31 = vpack.c.bf16 %v390_v30, %v389_v29  ;;  %v482_v60 = vld [vmem:[%s1683_s9] sm:$0xff] }
  0x2a   :  { %1077 = vmatprep.subr.bf16.mxu0 %v1196_v3  ;;  %1098 = vmatprep.subr.bf16.mxu1 %v1196_v3  ;;  %v1123_v62 = vpack.c.bf16 %v483_v61, %v482_v60  ;;  %v875_v30 = vld [vmem:[%s1684_s10] ss:$0 sm:$0xff] }
  0x2b   :  { %1100 = vmatpush3.bf16.msra.mxu1 %v1099_v23  ;;  %963 = vmatprep.mubr.msk.f32.mxu1 %vm1198_vm2, %v1197_v56  ;;  %v1138_v23 = vpack.c.bf16 %v580_v22, %v579_v21  ;;  %v881_v60 = vld [vmem:[%s1688_s14] ss:$0 sm:$0xff]  ;;  %s1172_s14 = scalar_lea.vmem %s855_s25, 32 }
  0x2c   :  { %1101 = vmatprep.subr.bf16.mxu1 %v1196_v3  ;;  %p1173_p0 = scmp.ne.s32.totalorder %s855_s25, %s1172_s14  ;;  %p1178_p2 = scmp.lt.s32.totalorder %s1172_s14, %s1172_s14 }
  0x2d   :  { %1079 = vmatpush1.bf16.msra.mxu0 %v1078_v63  ;;  %v484_v63 = vld [vmem:[%s1683_s9 + $0x10] sm:$0xff] }
  0x2e   :  { %1080 = vmatprep.subr.bf16.mxu0 %v1196_v3  ;;  %v1126_v1 = vpack.c.bf16 %v485_v0, %v484_v63  ;;  %p1179_p3 = por %p1178_p2, %p1177_p1 }
  0x2f   :  { %1103 = vmatpush3.bf16.msra.mxu1 %v1102_v25  ;;  %v582_v25 = vld [vmem:[%s1685_s11 + $0x28] sm:$0xff] }
  0x30   :  { %1104 = vmatprep.subr.bf16.mxu1 %v1196_v3  ;;  %v1141_v26 = vpack.c.bf16 %v582_v25, %v581_v24  ;;  %p1180_p4 = pnand %p1179_p3, %p1173_p0 }
  0x31   :  { %1082 = vmatpush1.bf16.msra.mxu0 %v1081_v2  ;;  %v486_v2 = vld [vmem:[%s1683_s9 + $0x20] sm:$0xff] }
  0x32   :  { %1083 = vmatprep.subr.bf16.mxu0 %v1196_v3  ;;  %v1129_v5 = vpack.c.bf16 %v487_v4, %v486_v2 }
  0x33   :  { %1106 = vmatpush3.bf16.msra.mxu1 %v1105_v28  ;;  %v584_v28 = vld [vmem:[%s1685_s11 + $0x38] sm:$0xff] }
  0x34   :  { %1107 = vmatprep.subr.bf16.mxu1 %v1196_v3  ;;  %v1144_v29 = vpack.c.bf16 %v584_v28, %v583_v27 }
  0x35   :  { %1085 = vmatpush1.bf16.msra.mxu0 %v1084_v6  ;;  %v488_v6 = vld [vmem:[%s1683_s9 + $0x30] sm:$0xff] }
  0x36   :  { %1086 = vmatprep.subr.bf16.mxu0 %v1196_v3  ;;  %v1132_v8 = vpack.c.bf16 %v489_v7, %v488_v6 }
  0x37   :  { %1109 = vmatpush3.bf16.msra.mxu1 %v1108_v31 }
  0x38   :  { %1110 = vmatprep.subr.bf16.mxu1 %v1196_v3 }
  0x39   :  { %1088 = vmatpush1.bf16.msra.mxu0 %v1087_v9  ;;  %v873_v9 = vld [vmem:[%s1682_s8] ss:$0 sm:$0xff] }
  0x3a   :  { %1089 = vmatprep.subr.bf16.mxu0 %v1196_v3 }
  0x3b   :  { %1112 = vmatpush3.bf16.msra.mxu1 %v1111_v34 }
  0x3c   :  { %1113 = vmatprep.subr.bf16.mxu1 %v1196_v3 }
  0x3d   :  { %1091 = vmatpush1.bf16.msra.mxu0 %v1090_v12 }
  0x3e   :  { %1092 = vmatprep.subr.bf16.mxu0 %v1196_v3 }
  0x3f   :  { %1115 = vmatpush3.bf16.msra.mxu1 %v1114_v38 }
  0x40   :  { %1116 = vmatprep.subr.bf16.mxu1 %v1196_v3 }
  0x41   :  { %1094 = vmatpush1.bf16.msra.mxu0 %v1093_v15 }
  0x42   :  { %1095 = vmatprep.subr.bf16.mxu0 %v1196_v3 }
  0x43   :  { %1118 = vmatpush3.bf16.msra.mxu1 %v1117_v40  ;;  %v672_v40 = vld [vmem:[%s1687_s13 + $0x8] sm:$0xff] }
  0x44   :  { %1119 = vmatprep.subr.bf16.mxu1 %v1196_v3  ;;  %v1147_v41 = vpack.c.bf16 %v672_v40, %v671_v39 }
  0x45   :  { %1097 = vmatpush1.bf16.msra.mxu0 %v1096_v18  ;;  %v577_v18 = vld [vmem:[%s1685_s11] sm:$0xff] }
  0x46   :  { %330 = vmatprep.subr.mxu0 %v1197_v56 }
  0x47   :  { %1121 = vmatpush3.bf16.msra.mxu1 %v1120_v43 }
  0x48   :  { %1122 = vmatprep.subr.bf16.mxu1 %v1196_v3 }
  0x49   :  { %869 = vmatpush1.msk.msra.mxu0 %vm106_vm1, %v282_v19  ;;  %v578_v19 = vld [vmem:[%s1685_s11 + $0x8] sm:$0xff] }
  0x4a   :  { %363 = vmatmul.mubr.f32.vlgmr.msra.gmra.mrb[2].mxu0 %v868_v55  ;;  %1134 = vmatprep.subr.bf16.mxu0 %v1196_v3  ;;  %v1135_v20 = vpack.c.bf16 %v578_v19, %v577_v18 }
  0x4b   :  { %1001 = vmatprep.mubr.msk.f32.mxu0 %vm1198_vm2, %v1197_v56 }
  0x4c   :  { %1136 = vmatpush3.bf16.msra.mxu0 %v1135_v20 }
  0x4d   :  { %1137 = vmatprep.subr.bf16.mxu0 %v1196_v3 }
  0x50   :  { %1139 = vmatpush3.bf16.msra.mxu0 %v1138_v23 }
  0x51   :  { %1140 = vmatprep.subr.bf16.mxu0 %v1196_v3 }
  0x54   :  { %1142 = vmatpush3.bf16.msra.mxu0 %v1141_v26 }
  0x55   :  { %1143 = vmatprep.subr.bf16.mxu0 %v1196_v3 }
  0x58   :  { %1145 = vmatpush3.bf16.msra.mxu0 %v1144_v29 }
  0x59   :  { %1152 = vmatprep.subr.bf16.mxu0 %v1196_v3 }
  0xfa   :  { %v176_v44 = vpop.f32.mrb[0].mxu0 }
  0xfb   :  { %v178_v45 = vpop.f32.mrb[1].mxu0  ;;  %v261_v46 = vpop.f32.mrb[0].mxu1 }
  0xfc   :  { %v262_v47 = vadd.f32 %v261_v46, %v176_v44  ;;  %v263_v48 = vpop.f32.mrb[1].mxu1  ;;  %v878_v44 = vld [vmem:[%s1686_s12] ss:$0 sm:$0xff] }
 0x11d   :  { %v364_v49 = vpop.f32.mrb[2].mxu0 }
 0x11e   :  { %v368_v51 = vadd.f32 %v364_v49, %v262_v47  ;;  %v366_v52 = vpop.f32.mrb[3].mxu0 }
 0x120   :  { %v376_v53 = vadd.f32 %v871_v50, %v368_v51 }
 0x122   :  { %v378_v54 = vmin.f32 %v376_v53, 0.0  ;;  %vm377_vm3 = vcmp.gt.f32.partialorder %v376_v53, 0.0 }
 0x124   :  { %v379_v55 = vmul.f32 1.442695, %v378_v54  ;;  %v763_v54 = vld [vmem:[%s1689_s15 + $0x8] sm:$0xff] }
 0x126   :  { %1162 = vpow2.f32 %v379_v55 }
 0x130   :  { %v1163_v57 = vpop.eup %1162 }
 0x131   :  { %v872_v58 = vadd.f32 -1.0, %v1163_v57  ;;  %v764_v57 = vld [vmem:[%s1689_s15 + $0x10] sm:$0xff] }
 0x133   :  { %v382_v59 = vsel %vm377_vm3, %v376_v53, %v872_v58  ;;  %v762_v53 = vld [vmem:[%s1689_s15] sm:$0xff]  ;;  %v765_v58 = vld [vmem:[%s1689_s15 + $0x18] sm:$0xff] }
 0x134   :  { %964 = vmatmul.mubr.f32.vlgmr.msra.gmra.mrb[2].mxu1 %v382_v59  ;;  %v1153_v55 = vpack.c.bf16 %v763_v54, %v762_v53  ;;  %v1156_v59 = vpack.c.bf16 %v765_v58, %v764_v57 }
 0x135   :  { %982 = vmatprep.mubr.msk.f32.mxu1 %vm1198_vm2, %v1197_v56  ;;  %1124 = vmatpush3.bf16.msra.mxu1 %v1123_v62 }
 0x136   :  { %1125 = vmatprep.subr.bf16.mxu1 %v1196_v3 }
 0x139   :  { %1127 = vmatpush3.bf16.msra.mxu1 %v1126_v1 }
 0x13a   :  { %1128 = vmatprep.subr.bf16.mxu1 %v1196_v3 }
 0x13d   :  { %1130 = vmatpush3.bf16.msra.mxu1 %v1129_v5  ;;  %v884_v5 = vld [vmem:[%s1690_s16] ss:$0 sm:$0xff] }
 0x13e   :  { %1131 = vmatprep.subr.bf16.mxu1 %v1196_v3 }
 0x141   :  { %1133 = vmatpush3.bf16.msra.mxu1 %v1132_v8 }
 0x142   :  { %1146 = vmatprep.subr.bf16.mxu1 %v1196_v3 }
 0x207   :  { %v472_v10 = vpop.f32.mrb[2].mxu1 }
 0x208   :  { %v473_v11 = vadd.f32 %v873_v9, %v472_v10  ;;  %v965_v12 = vpop.f32.mrb[3].mxu1 }
 0x20a   :  { %v477_v13 = vmin.f32 %v473_v11, 0.0  ;;  %vm476_vm5 = vcmp.gt.f32.partialorder %v473_v11, 0.0 }
 0x20c   :  { %v478_v14 = vmul.f32 1.442695, %v477_v13 }
 0x20e   :  { %1164 = vpow2.f32 %v478_v14 }
 0x218   :  { %v1165_v15 = vpop.eup %1164 }
 0x219   :  { %v874_v16 = vadd.f32 -1.0, %v1165_v15 }
 0x21b   :  { %v481_v17 = vsel %vm476_vm5, %v473_v11, %v874_v16 }
 0x21c   :  { %983 = vmatmul.mubr.msk.f32.vlgmr.msra.gmra.mrb[4].mxu1 %vm497_vm4, %v481_v17 }
 0x21d   :  { %1012 = vmatprep.mubr.msk.f32.mxu1 %vm1198_vm2, %v1197_v56  ;;  %1148 = vmatpush3.bf16.msra.mxu1 %v1147_v41 }
 0x21e   :  { %1149 = vmatprep.subr.bf16.mxu1 %v1196_v3 }
 0x2ef   :  { %v567_v31 = vpop.f32.mrb[4].mxu1 }
 0x2f0   :  { %v568_v32 = vadd.f32 %v875_v30, %v567_v31  ;;  %v984_v33 = vpop.f32.mrb[5].mxu1 }
 0x2f2   :  { %v572_v34 = vmin.f32 %v568_v32, 0.0  ;;  %vm571_vm6 = vcmp.gt.f32.partialorder %v568_v32, 0.0 }
 0x2f4   :  { %v573_v35 = vmul.f32 1.442695, %v572_v34 }
 0x2f6   :  { %1166 = vpow2.f32 %v573_v35 }
 0x300   :  { %v1167_v36 = vpop.eup %1166 }
 0x301   :  { %v877_v37 = vadd.f32 -1.0, %v1167_v36 }
 0x303   :  { %v576_v38 = vsel %vm571_vm6, %v568_v32, %v877_v37 }
 0x304   :  { %1002 = vmatmul.mubr.msk.f32.vlgmr.msra.gmra.mrb[4].mxu0 %vm497_vm4, %v576_v38 }
 0x305   :  { %1023 = vmatprep.mubr.msk.f32.mxu0 %vm1198_vm2, %v1197_v56  ;;  %v674_v56 = vld [vmem:[%s1687_s13 + $0x18] sm:$0xff]  ;;  %1154 = vmatpush3.bf16.msra.mxu0 %v1153_v55 }
 0x306   :  { %v1150_v43 = vpack.c.bf16 %v674_v56, %v673_v42  ;;  %1155 = vmatprep.subr.bf16.mxu0 %v1196_v3 }
 0x308   :  { %1151 = vmatpush3.bf16.msra.mxu1 %v1150_v43 }
 0x309   :  { %1157 = vmatpush3.bf16.msra.mxu0 %v1156_v59 }
 0x3d7   :  { %v661_v45 = vpop.f32.mrb[4].mxu0 }
 0x3d8   :  { %v662_v46 = vadd.f32 %v878_v44, %v661_v45  ;;  %v1003_v47 = vpop.f32.mrb[5].mxu0 }
 0x3da   :  { %v666_v48 = vmin.f32 %v662_v46, 0.0  ;;  %vm665_vm8 = vcmp.gt.f32.partialorder %v662_v46, 0.0 }
 0x3dc   :  { %v667_v49 = vmul.f32 1.442695, %v666_v48 }
 0x3de   :  { %1168 = vpow2.f32 %v667_v49 }
 0x3e8   :  { %v1169_v50 = vpop.eup %1168 }
 0x3e9   :  { %v880_v51 = vadd.f32 -1.0, %v1169_v50 }
 0x3eb   :  { %v670_v52 = vsel %vm665_vm8, %v662_v46, %v880_v51 }
 0x3ec   :  { %1013 = vmatmul.mubr.msk.f32.vlgmr.msra.gmra.mrb[6].mxu1 %vm682_vm7, %v670_v52 }
 0x4bf   :  { %v752_v61 = vpop.f32.mrb[6].mxu1 }
 0x4c0   :  { %v753_v62 = vadd.f32 %v881_v60, %v752_v61  ;;  %v1014_v63 = vpop.f32.mrb[7].mxu1 }
 0x4c2   :  { %v757_v0 = vmin.f32 %v753_v62, 0.0  ;;  %vm756_vm9 = vcmp.gt.f32.partialorder %v753_v62, 0.0 }
 0x4c4   :  { %v758_v1 = vmul.f32 1.442695, %v757_v0 }
 0x4c6   :  { %1170 = vpow2.f32 %v758_v1 }
 0x4d0   :  { %v1171_v3 = vpop.eup %1170 }
 0x4d1   :  { %v883_v2 = vadd.f32 -1.0, %v1171_v3 }
 0x4d3   :  { %v761_v4 = vsel %vm756_vm9, %v753_v62, %v883_v2 }
 0x4d4   :  { %1024 = vmatmul.mubr.msk.f32.vlgmr.msra.gmra.mrb[6].mxu0 %vm682_vm7, %v761_v4 }
 0x5a7   :  { %v842_v6 = vpop.f32.mrb[6].mxu0 }
 0x5a8   :  { %v843_v7 = vadd.f32 %v884_v5, %v842_v6  ;;  %v1025_v8 = vpop.f32.mrb[7].mxu0 }
 0x5aa   :  { %847 = vst.msk [vmem:[#allocation2] sm:$0x3] %vm846_vm10, %v843_v7 }
 0x5ab   :  { %1183 = shalt.err (!%p1180_p4)
}
 0x5ac   :  { %s1184_s28 = scalar_lea.hbm %s1691_s17, 32 }
 0x5ad   :  { %p1185_p5 = scmp.ne.s32.totalorder %s1691_s17, %s1184_s28  ;;  %p1188_p6 = scmp.lt.u32.totalorder %s1184_s28, %s1691_s17 }
 0x5af   :  { %p1190_p7 = pnand %p1188_p6, %p1185_p5 }
 0x5b1   :  { %1193 = shalt.err (!%p1190_p7)
}
 0x5b2   :  { %857 = dma.vmem_to_hbm [thread:$0]  %s855_s25, 32, %s1691_s17, [#allocation3]  }
 0x5b3   :  { %1194 = dma.done.wait [#allocation3], 32  }
 0x5b4   :  { %1195 = vsyncadd [#allocation3], 4294967264 }
 0x5b5   :  { %861 = vsyncpa [#allocation3], 1 }

</bundles_post_ra>
